<compile_context>
chip_gen: v7x
topology: tpu7x:2x2x1
jax: 0.10.0
libtpu: 0.0.40
codegen_flags: <defaults>
</compile_context>

<pallas_src>
import math
import jax
import jax.numpy as jnp
from jax import lax
from jax.experimental import pallas as pl
from jax.experimental.pallas import tpu as pltpu  # noqa: F401  (only needed when scaling up: CompilerParams / grids)

# ---- small, module-consistent shapes -----------------------------------------
B, S, D = 2, 8, 32            # batch, seq_len, dim_model
H = 4                         # num_attention_heads
DH = D // H                   # dim_head
FF = 64                       # dim_ffn
EPS = 0.02                    # layer_norm_eps (RMSNorm eps)
SCALE = math.sqrt(float(DH))  # dot_scale = sqrt(dim_head)
N = B * S                     # batch folded into the matmul M dimension

# rows of the packed constants slab (shape (16, 5*D) f32)
_ROW_GPRE, _ROW_GPOST, _ROW_BQKV, _ROW_BO, _ROW_BGU, _ROW_BD = 0, 1, 2, 3, 4, 5
_ROW_HMASK = 8                # rows 8 .. 8+H-1 hold the per-head lane masks


# ---- the fused Pallas kernel: whole layer in a single grid-less invocation ----
def stm_kernel(x_ref, rope_ref, cvec_ref, wqkv_ref, wo_ref, wgu_ref, wd_ref, o_ref):
    f32, bf16 = jnp.float32, jnp.bfloat16
    x = x_ref[...]                                                    # (N, D) f32

    # unpack the constants slab (static row/lane slices of one VMEM buffer)
    gpre = cvec_ref[_ROW_GPRE:_ROW_GPRE + 1, 0:D]                     # (1, D)
    gpost = cvec_ref[_ROW_GPOST:_ROW_GPOST + 1, 0:D]
    bqkv = cvec_ref[_ROW_BQKV:_ROW_BQKV + 1, :]                       # (1, 5D)
    bo = cvec_ref[_ROW_BO:_ROW_BO + 1, 0:D]
    bgu = cvec_ref[_ROW_BGU:_ROW_BGU + 1, 0:2 * FF]                   # (1, 2*FF)
    bd = cvec_ref[_ROW_BD:_ROW_BD + 1, 0:D]
    hmask = cvec_ref[_ROW_HMASK:_ROW_HMASK + H, 0:D].reshape(H, 1, 1, D)  # (H,1,1,D) 0/1 f32

    # pre-attention RMSNorm (torch.nn.RMSNorm: x * rsqrt(mean(x^2) + eps) * gain)
    ln = x * lax.rsqrt(jnp.mean(x * x, axis=-1, keepdims=True) + EPS) * gpre

    # one wide bf16 MXU matmul: [Wq/s, (Wq/s)R, Wk, WkR, Wv] pre-fused, so
    # rotate_half and the 1/sqrt(dim_head) score scale are already folded in.
    # RoPE cos/sin is one elementwise multiply by the precomputed (N,5D) slab.
    proj = (jnp.dot(ln.astype(bf16), wqkv_ref[...],
                    preferred_element_type=f32) + bqkv) * rope_ref[...]   # (N, 5D)
    q = proj[:, 0 * D:1 * D] + proj[:, 1 * D:2 * D]                   # (N, D), pre-scaled by 1/sqrt(dh)
    k = proj[:, 2 * D:3 * D] + proj[:, 3 * D:4 * D]
    v = proj[:, 4 * D:5 * D]

    # attention: ALL heads in one batched pass.  Each head's q/v keep only their
    # own D/H lanes (multiply by the 0/1 lane mask); k stays full so q_h . k gives
    # exactly head h's dot product.  Heads stack into the batch dim of the einsum.
    qm = (q.reshape(1, B, S, D) * hmask).reshape(H * B, S, D).astype(bf16)
    vm = (v.reshape(1, B, S, D) * hmask).reshape(H * B, S, D).astype(bf16)
    kb = jnp.broadcast_to(k.astype(bf16).reshape(1, B, S, D),
                          (H, B, S, D)).reshape(H * B, S, D)

    s = jnp.einsum('bqd,bkd->bqk', qm, kb, preferred_element_type=f32)    # (H*B,S,S)
    s = s - jnp.max(s, axis=-1, keepdims=True)
    e = jnp.exp(s)
    p = e / jnp.sum(e, axis=-1, keepdims=True)                            # exact softmax
    o4 = jnp.einsum('bqk,bkd->bqd', p.astype(bf16), vm,
                    preferred_element_type=f32)                           # (H*B,S,D)
    # each head only populated its own lanes -> summing over heads == concat
    attn = jnp.sum(o4.reshape(H, B, S, D), axis=0).reshape(N, D)

    # output projection + residual (attention / hidden dropout = identity in eval)
    attn = jnp.dot(attn.astype(bf16), wo_ref[...],
                   preferred_element_type=f32) + bo
    res = attn + x

    # post RMSNorm + fused SwiGLU FFN (gate|up in one (D, 2*FF) matmul) + residual
    ln2 = res * lax.rsqrt(jnp.mean(res * res, axis=-1, keepdims=True) + EPS) * gpost
    gu = jnp.dot(ln2.astype(bf16), wgu_ref[...],
                 preferred_element_type=f32) + bgu                        # (N, 2*FF)
    ffn = jnp.dot((jax.nn.silu(gu[:, :FF]) * gu[:, FF:]).astype(bf16),
                  wd_ref[...], preferred_element_type=f32) + bd

    # NOTE: output kept (N, D) = (16, 32); at this size an in-kernel relayout to a
    # lane-dense slab would cost more than the masked store it saves.
    o_ref[...] = (ffn + res).astype(o_ref.dtype)


# ---- one-time weight/constant fusion (run ONCE at init, NOT per forward call) --
def prepare_params(params):
    (cosf, sinf, rotf, gpre, gpost, wq, bq, wk, bk, wv, bv, wo, bo,
     wg, bg, wu, bu, wd, bd) = params
    bf16 = jnp.bfloat16
    W5 = 5 * D

    # fold 1/sqrt(dim_head) into the Q projection; fold rotate_half (q @ R) into
    # extra weight columns so RoPE needs no in-kernel rotation matmul.
    wq_s, bq_s = wq / SCALE, bq / SCALE
    wqkv = jnp.concatenate([wq_s, wq_s @ rotf, wk, wk @ rotf, wv], axis=1).astype(bf16)  # (D, 5D)
    bqkv = jnp.concatenate([bq_s, bq_s @ rotf, bk, bk @ rotf, bv], axis=1)               # (1, 5D)
    wgu = jnp.concatenate([wg, wu], axis=1).astype(bf16)                                 # (D, 2*FF)
    bgu = jnp.concatenate([bg, bu], axis=1)                                              # (1, 2*FF)

    # RoPE multiplier slab: [cos | sin | cos | sin | ones] per position, tiled over batch
    rope = jnp.tile(jnp.concatenate([cosf, sinf, cosf, sinf, jnp.ones_like(cosf)],
                                    axis=1), (B, 1)).astype(jnp.float32)                 # (N, 5D)

    # pack every small per-lane constant + the per-head lane masks into ONE slab
    def row(vec):
        return jnp.pad(vec.astype(jnp.float32), ((0, 0), (0, W5 - vec.shape[1])))

    head_mask = ((jnp.arange(D)[None, :] // DH) ==
                 jnp.arange(H)[:, None]).astype(jnp.float32)                             # (H, D)
    cvec = jnp.concatenate([
        row(gpre), row(gpost), row(bqkv), row(bo), row(bgu), row(bd),
        jnp.zeros((_ROW_HMASK - 6, W5), jnp.float32),
        row(head_mask),
        jnp.zeros((16 - _ROW_HMASK - H, W5), jnp.float32),
    ], axis=0)                                                                           # (16, 5D)

    return (rope, cvec, wqkv, wo.astype(bf16), wgu, wd.astype(bf16))


# ---- per-call wrapper: reshape + a single grid-less pallas_call, nothing else ---
@jax.jit
def stm_forward(x, fused):
    rope, cvec, wqkv, wo, wgu, wd = fused
    out = pl.pallas_call(
        stm_kernel,
        out_shape=jax.ShapeDtypeStruct((N, D), jnp.float32),
    )(x.reshape(N, D), rope, cvec, wqkv, wo, wgu, wd)
    return out.reshape(B, S, D)


# ---- pure-JAX f32 reference (unfused math) for a correctness check -------------
def reference(x, params):
    (cosf, sinf, rotf, gpre, gpost, wq, bq, wk, bk, wv, bv, wo, bo,
     wg, bg, wu, bu, wd, bd) = params

    def rms(t, g):
        return t * jax.lax.rsqrt(jnp.mean(t * t, axis=-1, keepdims=True) + EPS) * g

    ln = rms(x, gpre)
    q = ln @ wq + bq
    k = ln @ wk + bk
    v = ln @ wv + bv
    q = q * cosf + (q @ rotf) * sinf
    k = k * cosf + (k @ rotf) * sinf

    def split(t):
        return t.reshape(B, S, H, DH).transpose(0, 2, 1, 3)

    qh, kh, vh = split(q), split(k), split(v)
    s = jnp.einsum('bhqd,bhkd->bhqk', qh, kh) / SCALE
    p = jax.nn.softmax(s, axis=-1)
    o = jnp.einsum('bhqk,bhkd->bhqd', p, vh).transpose(0, 2, 1, 3).reshape(B, S, D)
    res = o @ wo + bo + x
    ln2 = rms(res, gpost)
    g = ln2 @ wg + bg
    u = ln2 @ wu + bu
    return (jax.nn.silu(g) * u) @ wd + bd + res


if __name__ == "__main__":
    key = jax.random.PRNGKey(0)
    ks = jax.random.split(key, 20)

    def init(k, shape, scale=0.05):
        return jax.random.normal(k, shape, jnp.float32) * scale

    # RoFormer sinusoidal encoding: sinusoidal_pos = concat([sin, cos], -1), then
    # interleaved-duplicated (stack([t, t], -1).reshape == repeat(t, 2, -1)).
    pos = jnp.arange(S, dtype=jnp.float32)[:, None]
    inv_freq = 1.0 / (10000.0 ** (jnp.arange(0, DH, 2, dtype=jnp.float32) / DH))
    angles = pos * inv_freq[None, :]                       # (S, DH//2)
    sin_pos = jnp.repeat(jnp.sin(angles), 2, axis=-1)      # (S, DH)
    cos_pos = jnp.repeat(jnp.cos(angles), 2, axis=-1)      # (S, DH)
    cosf = jnp.tile(cos_pos, (1, H))                       # (S, D) broadcast over heads
    sinf = jnp.tile(sin_pos, (1, H))

    # rotate_half as a matmul: R[2i+1, 2i] = -1, R[2i, 2i+1] = +1; block-diag per head
    r = jnp.zeros((DH, DH), jnp.float32)
    even = jnp.arange(0, DH, 2)
    r = r.at[even + 1, even].set(-1.0).at[even, even + 1].set(1.0)
    rotf = jnp.kron(jnp.eye(H, dtype=jnp.float32), r)      # (D, D)

    gpre = 1.0 + init(ks[0], (1, D), 0.1)
    gpost = 1.0 + init(ks[1], (1, D), 0.1)
    wq, bq = init(ks[2], (D, D)), init(ks[3], (1, D))
    wk, bk = init(ks[4], (D, D)), init(ks[5], (1, D))
    wv, bv = init(ks[6], (D, D)), init(ks[7], (1, D))
    wo, bo = init(ks[8], (D, D)), init(ks[9], (1, D))
    wg, bg = init(ks[10], (D, FF)), init(ks[11], (1, FF))
    wu, bu = init(ks[12], (D, FF)), init(ks[13], (1, FF))
    wd, bd = init(ks[14], (FF, D)), init(ks[15], (1, D))

    params = (cosf, sinf, rotf, gpre, gpost, wq, bq, wk, bk, wv, bv, wo, bo,
              wg, bg, wu, bu, wd, bd)

    # weight fusion happens exactly once here; per-call path is reshape + kernel.
    fused = prepare_params(params)
    jax.block_until_ready(fused)

    x = jax.random.normal(ks[16], (B, S, D), jnp.float32)

    out = stm_forward(x, fused)
    jax.block_until_ready(out)

    ref = reference(x, params)
    assert out.shape == (B, S, D)
    # kernel uses bf16 MXU operands (f32 accumulation); softmax uses the exact
    # denominator, so the remaining error is the bf16 weight/activation cast.
    assert jnp.allclose(out, ref, atol=2e-2, rtol=2e-2), float(jnp.max(jnp.abs(out - ref)))
    print("KERNEL_OK")
</pallas_src>

<mosaic_0001>
module attributes {stable_mosaic.version = 11 : i64} {
  func.func @stm_kernel(%arg0: memref<16x32xf32, #tpu.memory_space<vmem>>, %arg1: memref<16x160xf32, #tpu.memory_space<vmem>>, %arg2: memref<16x160xf32, #tpu.memory_space<vmem>>, %arg3: memref<32x160xbf16, #tpu.memory_space<vmem>>, %arg4: memref<32x32xbf16, #tpu.memory_space<vmem>>, %arg5: memref<32x128xbf16, #tpu.memory_space<vmem>>, %arg6: memref<64x32xbf16, #tpu.memory_space<vmem>>, %arg7: memref<16x32xf32, #tpu.memory_space<vmem>>) attributes {dimension_semantics = [], scalar_prefetch = 0 : i64, scratch_operands = 0 : i64, tpu.core_type = #tpu.core_type<tc>} {
    %c0 = arith.constant 0 : index
    %c0_0 = arith.constant 0 : index
    %0 = vector.load %arg0[%c0, %c0_0] : memref<16x32xf32, #tpu.memory_space<vmem>>, vector<16x32xf32>
    %c0_1 = arith.constant 0 : index
    %c0_2 = arith.constant 0 : index
    %1 = vector.load %arg2[%c0_1, %c0_2] : memref<16x160xf32, #tpu.memory_space<vmem>>, vector<1x32xf32>
    %c1 = arith.constant 1 : index
    %c0_3 = arith.constant 0 : index
    %2 = vector.load %arg2[%c1, %c0_3] : memref<16x160xf32, #tpu.memory_space<vmem>>, vector<1x32xf32>
    %c2 = arith.constant 2 : index
    %c0_4 = arith.constant 0 : index
    %3 = vector.load %arg2[%c2, %c0_4] : memref<16x160xf32, #tpu.memory_space<vmem>>, vector<1x160xf32>
    %c3 = arith.constant 3 : index
    %c0_5 = arith.constant 0 : index
    %4 = vector.load %arg2[%c3, %c0_5] : memref<16x160xf32, #tpu.memory_space<vmem>>, vector<1x32xf32>
    %c4 = arith.constant 4 : index
    %c0_6 = arith.constant 0 : index
    %5 = vector.load %arg2[%c4, %c0_6] : memref<16x160xf32, #tpu.memory_space<vmem>>, vector<1x128xf32>
    %c5 = arith.constant 5 : index
    %c0_7 = arith.constant 0 : index
    %6 = vector.load %arg2[%c5, %c0_7] : memref<16x160xf32, #tpu.memory_space<vmem>>, vector<1x32xf32>
    %c8 = arith.constant 8 : index
    %c0_8 = arith.constant 0 : index
    %7 = vector.load %arg2[%c8, %c0_8] : memref<16x160xf32, #tpu.memory_space<vmem>>, vector<4x32xf32>
    %8 = vector.shape_cast %7 : vector<4x32xf32> to vector<4x1x1x32xf32>
    %9 = arith.mulf %0, %0 : vector<16x32xf32>
    %cst = arith.constant dense<0.000000e+00> : vector<16xf32>
    %10 = vector.multi_reduction <add>, %9, %cst [1] : vector<16x32xf32> to vector<16xf32>
    %11 = vector.shape_cast %10 : vector<16xf32> to vector<16x1xf32>
    %cst_9 = arith.constant 3.200000e+01 : f32
    %12 = vector.broadcast %cst_9 : f32 to vector<16x1xf32>
    %13 = arith.divf %11, %12 : vector<16x1xf32>
    %cst_10 = arith.constant 2.000000e-02 : f32
    %14 = vector.broadcast %cst_10 : f32 to vector<16x1xf32>
    %15 = arith.addf %13, %14 : vector<16x1xf32>
    %16 = math.rsqrt %15 : vector<16x1xf32>
    %17 = vector.broadcast %16 : vector<16x1xf32> to vector<16x32xf32>
    %18 = arith.mulf %0, %17 : vector<16x32xf32>
    %19 = vector.broadcast %1 : vector<1x32xf32> to vector<16x32xf32>
    %20 = arith.mulf %18, %19 : vector<16x32xf32>
    %21 = arith.truncf %20 : vector<16x32xf32> to vector<16x32xbf16>
    %c0_11 = arith.constant 0 : index
    %c0_12 = arith.constant 0 : index
    %22 = vector.load %arg3[%c0_11, %c0_12] : memref<32x160xbf16, #tpu.memory_space<vmem>>, vector<32x160xbf16>
    %cst_13 = arith.constant dense<0.000000e+00> : vector<16x160xf32>
    %23 = tpu.matmul %21, %22, %cst_13 {dimension_numbers = #tpu.dot_dimension_numbers<[1], [0], [0], [1], [0, 0, 1, 1], [], []>} : vector<16x32xbf16>, vector<32x160xbf16>, vector<16x160xf32> -> vector<16x160xf32>
    %24 = vector.broadcast %3 : vector<1x160xf32> to vector<16x160xf32>
    %25 = arith.addf %23, %24 : vector<16x160xf32>
    %c0_14 = arith.constant 0 : index
    %c0_15 = arith.constant 0 : index
    %26 = vector.load %arg1[%c0_14, %c0_15] : memref<16x160xf32, #tpu.memory_space<vmem>>, vector<16x160xf32>
    %27 = arith.mulf %25, %26 : vector<16x160xf32>
    %28 = vector.extract_strided_slice %27 {offsets = [0, 0], sizes = [16, 32], strides = [1, 1]} : vector<16x160xf32> to vector<16x32xf32>
    %29 = vector.extract_strided_slice %27 {offsets = [0, 32], sizes = [16, 32], strides = [1, 1]} : vector<16x160xf32> to vector<16x32xf32>
    %30 = arith.addf %28, %29 : vector<16x32xf32>
    %31 = vector.extract_strided_slice %27 {offsets = [0, 64], sizes = [16, 32], strides = [1, 1]} : vector<16x160xf32> to vector<16x32xf32>
    %32 = vector.extract_strided_slice %27 {offsets = [0, 96], sizes = [16, 32], strides = [1, 1]} : vector<16x160xf32> to vector<16x32xf32>
    %33 = arith.addf %31, %32 : vector<16x32xf32>
    %34 = vector.extract_strided_slice %27 {offsets = [0, 128], sizes = [16, 32], strides = [1, 1]} : vector<16x160xf32> to vector<16x32xf32>
    %35 = vector.shape_cast %30 : vector<16x32xf32> to vector<1x2x8x32xf32>
    %36 = vector.broadcast %35 : vector<1x2x8x32xf32> to vector<4x2x8x32xf32>
    %37 = vector.broadcast %8 : vector<4x1x1x32xf32> to vector<4x2x8x32xf32>
    %38 = arith.mulf %36, %37 : vector<4x2x8x32xf32>
    %39 = vector.shape_cast %38 : vector<4x2x8x32xf32> to vector<8x8x32xf32>
    %40 = arith.truncf %39 : vector<8x8x32xf32> to vector<8x8x32xbf16>
    %41 = vector.shape_cast %34 : vector<16x32xf32> to vector<1x2x8x32xf32>
    %42 = vector.broadcast %41 : vector<1x2x8x32xf32> to vector<4x2x8x32xf32>
    %43 = vector.broadcast %8 : vector<4x1x1x32xf32> to vector<4x2x8x32xf32>
    %44 = arith.mulf %42, %43 : vector<4x2x8x32xf32>
    %45 = vector.shape_cast %44 : vector<4x2x8x32xf32> to vector<8x8x32xf32>
    %46 = arith.truncf %45 : vector<8x8x32xf32> to vector<8x8x32xbf16>
    %47 = arith.truncf %33 : vector<16x32xf32> to vector<16x32xbf16>
    %48 = vector.shape_cast %47 : vector<16x32xbf16> to vector<1x2x8x32xbf16>
    %49 = vector.shape_cast %48 : vector<1x2x8x32xbf16> to vector<1x2x8x32xbf16>
    %50 = vector.broadcast %49 : vector<1x2x8x32xbf16> to vector<4x2x8x32xbf16>
    %51 = vector.shape_cast %50 : vector<4x2x8x32xbf16> to vector<8x8x32xbf16>
    "tpu.trace_start"() <{level = 10 : i32, message = "bqd,bkd->bqk"}> : () -> ()
    %cst_16 = arith.constant dense<0.000000e+00> : vector<8x8x8xf32>
    %52 = tpu.matmul %40, %51, %cst_16 {dimension_numbers = #tpu.dot_dimension_numbers<[2], [2], [1], [1], [0, 0, 0, 1, 1, 1], [0], [0]>} : vector<8x8x32xbf16>, vector<8x8x32xbf16>, vector<8x8x8xf32> -> vector<8x8x8xf32>
    "tpu.trace_stop"() : () -> ()
    %cst_17 = arith.constant dense<0xFF800000> : vector<8x8xf32>
    %53 = vector.multi_reduction <maximumf>, %52, %cst_17 [2] : vector<8x8x8xf32> to vector<8x8xf32>
    %54 = vector.shape_cast %53 : vector<8x8xf32> to vector<8x8x1xf32>
    %55 = vector.broadcast %54 : vector<8x8x1xf32> to vector<8x8x8xf32>
    %56 = arith.subf %52, %55 : vector<8x8x8xf32>
    %57 = math.exp %56 : vector<8x8x8xf32>
    %cst_18 = arith.constant dense<0.000000e+00> : vector<8x8xf32>
    %58 = vector.multi_reduction <add>, %57, %cst_18 [2] : vector<8x8x8xf32> to vector<8x8xf32>
    %59 = vector.shape_cast %58 : vector<8x8xf32> to vector<8x8x1xf32>
    %60 = vector.broadcast %59 : vector<8x8x1xf32> to vector<8x8x8xf32>
    %61 = arith.divf %57, %60 : vector<8x8x8xf32>
    %62 = arith.truncf %61 : vector<8x8x8xf32> to vector<8x8x8xbf16>
    "tpu.trace_start"() <{level = 10 : i32, message = "bqk,bkd->bqd"}> : () -> ()
    %cst_19 = arith.constant dense<0.000000e+00> : vector<8x8x32xf32>
    %63 = tpu.matmul %62, %46, %cst_19 {dimension_numbers = #tpu.dot_dimension_numbers<[2], [1], [1], [2], [0, 0, 0, 1, 1, 2], [0], [0]>} : vector<8x8x8xbf16>, vector<8x8x32xbf16>, vector<8x8x32xf32> -> vector<8x8x32xf32>
    "tpu.trace_stop"() : () -> ()
    %64 = vector.shape_cast %63 : vector<8x8x32xf32> to vector<4x2x8x32xf32>
    %cst_20 = arith.constant dense<0.000000e+00> : vector<2x8x32xf32>
    %65 = vector.multi_reduction <add>, %64, %cst_20 [0] : vector<4x2x8x32xf32> to vector<2x8x32xf32>
    %66 = vector.shape_cast %65 : vector<2x8x32xf32> to vector<16x32xf32>
    %67 = arith.truncf %66 : vector<16x32xf32> to vector<16x32xbf16>
    %c0_21 = arith.constant 0 : index
    %c0_22 = arith.constant 0 : index
    %68 = vector.load %arg4[%c0_21, %c0_22] : memref<32x32xbf16, #tpu.memory_space<vmem>>, vector<32x32xbf16>
    %cst_23 = arith.constant dense<0.000000e+00> : vector<16x32xf32>
    %69 = tpu.matmul %67, %68, %cst_23 {dimension_numbers = #tpu.dot_dimension_numbers<[1], [0], [0], [1], [0, 0, 1, 1], [], []>} : vector<16x32xbf16>, vector<32x32xbf16>, vector<16x32xf32> -> vector<16x32xf32>
    %70 = vector.broadcast %4 : vector<1x32xf32> to vector<16x32xf32>
    %71 = arith.addf %69, %70 : vector<16x32xf32>
    %72 = arith.addf %71, %0 : vector<16x32xf32>
    %73 = arith.mulf %72, %72 : vector<16x32xf32>
    %cst_24 = arith.constant dense<0.000000e+00> : vector<16xf32>
    %74 = vector.multi_reduction <add>, %73, %cst_24 [1] : vector<16x32xf32> to vector<16xf32>
    %75 = vector.shape_cast %74 : vector<16xf32> to vector<16x1xf32>
    %cst_25 = arith.constant 3.200000e+01 : f32
    %76 = vector.broadcast %cst_25 : f32 to vector<16x1xf32>
    %77 = arith.divf %75, %76 : vector<16x1xf32>
    %cst_26 = arith.constant 2.000000e-02 : f32
    %78 = vector.broadcast %cst_26 : f32 to vector<16x1xf32>
    %79 = arith.addf %77, %78 : vector<16x1xf32>
    %80 = math.rsqrt %79 : vector<16x1xf32>
    %81 = vector.broadcast %80 : vector<16x1xf32> to vector<16x32xf32>
    %82 = arith.mulf %72, %81 : vector<16x32xf32>
    %83 = vector.broadcast %2 : vector<1x32xf32> to vector<16x32xf32>
    %84 = arith.mulf %82, %83 : vector<16x32xf32>
    %85 = arith.truncf %84 : vector<16x32xf32> to vector<16x32xbf16>
    %c0_27 = arith.constant 0 : index
    %c0_28 = arith.constant 0 : index
    %86 = vector.load %arg5[%c0_27, %c0_28] : memref<32x128xbf16, #tpu.memory_space<vmem>>, vector<32x128xbf16>
    %cst_29 = arith.constant dense<0.000000e+00> : vector<16x128xf32>
    %87 = tpu.matmul %85, %86, %cst_29 {dimension_numbers = #tpu.dot_dimension_numbers<[1], [0], [0], [1], [0, 0, 1, 1], [], []>} : vector<16x32xbf16>, vector<32x128xbf16>, vector<16x128xf32> -> vector<16x128xf32>
    %88 = vector.broadcast %5 : vector<1x128xf32> to vector<16x128xf32>
    %89 = arith.addf %87, %88 : vector<16x128xf32>
    %90 = vector.extract_strided_slice %89 {offsets = [0, 0], sizes = [16, 64], strides = [1, 1]} : vector<16x128xf32> to vector<16x64xf32>
    %91 = arith.negf %90 : vector<16x64xf32>
    %92 = math.exp %91 : vector<16x64xf32>
    %cst_30 = arith.constant 1.000000e+00 : f32
    %93 = vector.broadcast %cst_30 : f32 to vector<16x64xf32>
    %94 = arith.addf %93, %92 : vector<16x64xf32>
    %95 = arith.divf %93, %94 : vector<16x64xf32>
    %96 = arith.mulf %90, %95 : vector<16x64xf32>
    %97 = vector.extract_strided_slice %89 {offsets = [0, 64], sizes = [16, 64], strides = [1, 1]} : vector<16x128xf32> to vector<16x64xf32>
    %98 = arith.mulf %96, %97 : vector<16x64xf32>
    %99 = arith.truncf %98 : vector<16x64xf32> to vector<16x64xbf16>
    %c0_31 = arith.constant 0 : index
    %c0_32 = arith.constant 0 : index
    %100 = vector.load %arg6[%c0_31, %c0_32] : memref<64x32xbf16, #tpu.memory_space<vmem>>, vector<64x32xbf16>
    %cst_33 = arith.constant dense<0.000000e+00> : vector<16x32xf32>
    %101 = tpu.matmul %99, %100, %cst_33 {dimension_numbers = #tpu.dot_dimension_numbers<[1], [0], [0], [1], [0, 0, 1, 1], [], []>} : vector<16x64xbf16>, vector<64x32xbf16>, vector<16x32xf32> -> vector<16x32xf32>
    %102 = vector.broadcast %6 : vector<1x32xf32> to vector<16x32xf32>
    %103 = arith.addf %101, %102 : vector<16x32xf32>
    %104 = arith.addf %103, %72 : vector<16x32xf32>
    %c0_34 = arith.constant 0 : index
    %c0_35 = arith.constant 0 : index
    %105 = vector.load %arg7[%c0_34, %c0_35] : memref<16x32xf32, #tpu.memory_space<vmem>>, vector<16x32xf32>
    tpu.vector_store %arg7[%c0_34, %c0_35], %104 {strides = array<i32>} : memref<16x32xf32, #tpu.memory_space<vmem>>, vector<16x32xf32>,
    return
  }
}

</mosaic_0001>

<bundles_post_ra>
// kernel: stm_forward.1
= control target key start
LH: loop header
LB: loop body
LE: loop exit
PB: predicated region body
PF: predicated region fallthrough
CT: control target
= control target key end

     0   :  { %12 = vsyncpa [#allocation3], 0  ;;  %s2168_s0 = inlined_call_operand.vmem [shape: f32[16,32], index: 0, kind: input, shape index: {}]   ;;  %s2169_s1 = inlined_call_operand.vmem [shape: f32[16,160], index: 1, kind: input, shape index: {}]   ;;  %s2170_s2 = inlined_call_operand.hbm [shape: f32[16,160], index: 2, kind: input, shape index: {}]   ;;  %s2171_s3 = inlined_call_operand.hbm [shape: bf16[32,160], index: 3, kind: input, shape index: {}]   ;;  %s2172_s4 = inlined_call_operand.hbm [shape: bf16[32,32], index: 4, kind: input, shape index: {}]   ;;  %s2173_s5 = inlined_call_operand.hbm [shape: bf16[32,128], index: 5, kind: input, shape index: {}]   ;;  %s2174_s6 = inlined_call_operand.vmem [shape: bf16[64,32], index: 6, kind: input, shape index: {}]   ;;  %s2175_s7 = inlined_call_operand.hbm [shape: f32[16,32], index: 7, kind: output, shape index: {}]  }
   0x1   :  { %13 = vsyncpa [#allocation6], 0 }
   0x2   :  { %14 = vsyncpa [#allocation9], 0 }
   0x3   :  { %15 = vsyncpa [#allocation4], 0  ;;  %s1799_s24 = smov [#allocation5]   ;;  %s1681_s28 = scalar_lea.hbm %s2171_s3, 512 }
   0x4   :  { %s37_s25 = sshll.u32 %s1799_s24, 4  ;;  %p1682_p0 = scmp.ne.s32.totalorder %s2171_s3, %s1681_s28  ;;  %s38_s25 = int_to_ptr.vmem [resolvable:$true] %s37_s25 }
   0x5   :  { %p1685_p1 = scmp.lt.u32.totalorder %s1681_s28, %s2171_s3 }
   0x7   :  { %p1687_p2 = pnand %p1685_p1, %p1682_p0 }
   0x9   :  { %1690 = shalt.err (!%p1687_p2)
}
   0xa   :  { %s1691_s10 = scalar_lea.vmem %s38_s25, 512  ;;  %p1696_p4 = scmp.lt.s32.totalorder %s38_s25, %s38_s25 }
   0xb   :  { %p1692_p3 = scmp.ne.s32.totalorder %s38_s25, %s1691_s10  ;;  %p1697_p5 = scmp.lt.s32.totalorder %s1691_s10, %s1691_s10 }
   0xd   :  { %p1698_p6 = por %p1697_p5, %p1696_p4 }
   0xf   :  { %p1699_p7 = pnand %p1698_p6, %p1692_p3 }
  0x11   :  { %1702 = shalt.err (!%p1699_p7)
}
  0x12   :  { %s1800_s11 = smov 128   ;;  %s1801_s12 = smov 8  }
  0x13   :  { %43 = dma.hbm_to_vmem [thread:$0]  %s2171_s3, 512, %s38_s25, [#allocation6], %s1800_s11, %s1800_s11, %s1801_s12  }
  0x14   :  { %s1802_s15 = smov [#allocation2]   ;;  %s1703_s19 = scalar_lea.hbm %s2170_s2, 512 }
  0x15   :  { %s25_s16 = sshll.u32 %s1802_s15, 4  ;;  %p1704_p8 = scmp.ne.s32.totalorder %s2170_s2, %s1703_s19  ;;  %s26_s16 = int_to_ptr.vmem [resolvable:$true] %s25_s16 }
  0x16   :  { %p1707_p9 = scmp.lt.u32.totalorder %s1703_s19, %s2170_s2 }
  0x18   :  { %p1709_p10 = pnand %p1707_p9, %p1704_p8 }
  0x1a   :  { %1712 = shalt.err (!%p1709_p10)
}
  0x1b   :  { %s1713_s24 = scalar_lea.vmem %s26_s16, 512  ;;  %p1718_p12 = scmp.lt.s32.totalorder %s26_s16, %s26_s16 }
  0x1c   :  { %p1714_p11 = scmp.ne.s32.totalorder %s26_s16, %s1713_s24  ;;  %p1719_p13 = scmp.lt.s32.totalorder %s1713_s24, %s1713_s24 }
  0x1e   :  { %p1720_p0 = por %p1719_p13, %p1718_p12 }
  0x20   :  { %p1721_p1 = pnand %p1720_p0, %p1714_p11 }
  0x22   :  { %1724 = shalt.err (!%p1721_p1)
}
  0x23   :  { %s1803_s3 = smov 256   ;;  %s1804_s25 = smov 16  }
  0x24   :  { %31 = dma.hbm_to_vmem [thread:$0]  %s2170_s2, 512, %s26_s16, [#allocation3], %s1803_s3, %s1803_s3, %s1804_s25  }
  0x25   :  { %s1805_s28 = smov [#allocation7]   ;;  %s1725_s9 = scalar_lea.hbm %s2172_s4, 256 }
  0x26   :  { %s49_s29 = sshll.u32 %s1805_s28, 4  ;;  %p1726_p2 = scmp.ne.s32.totalorder %s2172_s4, %s1725_s9  ;;  %s50_s29 = int_to_ptr.vmem [resolvable:$true] %s49_s29 }
  0x27   :  { %p1729_p3 = scmp.lt.u32.totalorder %s1725_s9, %s2172_s4 }
  0x29   :  { %p1731_p4 = pnand %p1729_p3, %p1726_p2 }
  0x2b   :  { %1734 = shalt.err (!%p1731_p4)
}
  0x2c   :  { %s1735_s17 = scalar_lea.vmem %s50_s29, 256  ;;  %p1740_p6 = scmp.lt.s32.totalorder %s50_s29, %s50_s29 }
  0x2d   :  { %p1736_p5 = scmp.ne.s32.totalorder %s50_s29, %s1735_s17  ;;  %p1741_p7 = scmp.lt.s32.totalorder %s1735_s17, %s1735_s17 }
  0x2f   :  { %p1742_p8 = por %p1741_p7, %p1740_p6 }
  0x31   :  { %p1743_p9 = pnand %p1742_p8, %p1736_p5 }
  0x33   :  { %1746 = shalt.err (!%p1743_p9)
}
  0x34   :  { %s1806_s2 = smov 64   ;;  %s1807_s16 = smov 4  }
  0x35   :  { %55 = dma.hbm_to_vmem [thread:$0]  %s2172_s4, 256, %s50_s29, [#allocation6], %s1806_s2, %s1806_s2, %s1807_s16  }
  0x36   :  { %s1808_s20 = smov [#allocation8]   ;;  %s1747_s24 = scalar_lea.hbm %s2173_s5, 256 }
  0x37   :  { %s61_s21 = sshll.u32 %s1808_s20, 4  ;;  %p1748_p10 = scmp.ne.s32.totalorder %s2173_s5, %s1747_s24  ;;  %s62_s21 = int_to_ptr.vmem [resolvable:$true] %s61_s21 }
  0x38   :  { %p1751_p11 = scmp.lt.u32.totalorder %s1747_s24, %s2173_s5 }
  0x3a   :  { %p1753_p12 = pnand %p1751_p11, %p1748_p10 }
  0x3c   :  { %1756 = shalt.err (!%p1753_p12)
}
  0x3d   :  { %s1757_s28 = scalar_lea.vmem %s62_s21, 256  ;;  %p1762_p0 = scmp.lt.s32.totalorder %s62_s21, %s62_s21 }
  0x3e   :  { %p1758_p13 = scmp.ne.s32.totalorder %s62_s21, %s1757_s28  ;;  %p1763_p1 = scmp.lt.s32.totalorder %s1757_s28, %s1757_s28 }
  0x40   :  { %p1764_p2 = por %p1763_p1, %p1762_p0 }
  0x42   :  { %p1765_p3 = pnand %p1764_p2, %p1758_p13 }
  0x44   :  { %1768 = shalt.err (!%p1765_p3)
}
  0x45   :  { %67 = dma.hbm_to_vmem [thread:$0]  %s2173_s5, 256, %s62_s21, [#allocation9], %s1806_s2, %s1806_s2, %s1807_s16  }
  0x46   :  { %1791 = dma.done.wait [#allocation3], 512  }
  0x47   :  { %1792 = vsyncadd [#allocation3], 4294966784 }
  0x48   :  { %1793 = dma.done.wait [#allocation6], 768  }
  0x49   :  { %1794 = vsyncadd [#allocation6], 4294966528 }
  0x4a   :  { %1795 = dma.done.wait [#allocation9], 256  }
  0x4b   :  { %1796 = vsyncadd [#allocation9], 4294967040  ;;  %v1913_v0 = vld [vmem:[%s2168_s0] sm:$0xff]  ;;  %vm120_vm0 = vcmask 261120   ;;  %v1918_v1 = vld [vmem:[%s2168_s0 + $0x8] sm:$0xff]  ;;  %v1809_v9 = vmov 0   ;;  %v105_v25 = vlaneseq }
  0x4c   :  { %v118_v2 = vmul.f32 %v1913_v0, %v1913_v0  ;;  %v119_v3 = vmul.f32 %v1918_v1, %v1918_v1  ;;  %v1619_v6 = vld [vmem:[#allocation5 + $0x4] ss:$8 sps:$4 sm:$0xff]   ;;  %v1621_v7 = vld [vmem:[#allocation5] ss:$8 sps:$4 sm:$0xff]   ;;  %v1622_v8 = vld [vmem:[#allocation5 + $0x14] ss:$8 sps:$4 sm:$0xff]   ;;  %209 = vmatprep.mubr.bf16.mxu0 %v1809_v9 }
  0x4d   :  { %177 = vmatprep.subr.bf16.mxu0 %v1619_v6  ;;  %v1624_v10 = vld [vmem:[#allocation5 + $0x10] ss:$8 sps:$4 sm:$0xff]   ;;  %v85_v20 = vld [vmem:[#allocation2] ss:$0 sm:$0xff]  ;;  %v1810_v26 = vmov 1966171168  }
  0x4e   :  { %v121_v4 = vsel %vm120_vm0, %v118_v2, 0.0  ;;  %v124_v5 = vsel %vm120_vm0, %v119_v3, 0.0  ;;  %178 = vmatpush1.bf16.msra.mxu0 %v1621_v7  ;;  %v103_v27 = vunpack.c.l.s4 %v1810_v26  ;;  %v106_v28 = vshrl.u32 %v105_v25, 7  ;;  %v88_v34 = vld [vmem:[#allocation2 + $0x2] ss:$8 sm:$0x3] }
  0x4f   :  { %122 = vadd.xlane.f32.xlu0 %v121_v4  ;;  %179 = vmatprep.subr.bf16.mxu0 %v1622_v8  ;;  %v1397_v30 = vld.sshfl [vmem:[#allocation2 + $0x10] sm:$0x33 pattern:$0x75316420]  ;;  %v220_v43 = vld [vmem:[%s2169_s1] sm:$0xff]  ;;  %v221_v46 = vld [vmem:[%s2169_s1 + $0x8] sm:$0xff] }
  0x50   :  { %v104_v29 = vunpack.c.0.s8 %v103_v27  ;;  %v101_v32 = vcombine.high %v1397_v30, %v1397_v30  ;;  %v1929_v33 = vsub.s32 0, %v106_v28  ;;  %v150_v35 = vsub.s32 1, %v106_v28  ;;  %v223_v53 = vld [vmem:[%s2169_s1 + $0x18] sm:$0xff]  ;;  %v222_v57 = vld [vmem:[%s2169_s1 + $0x10] sm:$0xff]  ;;  %s1811_s19 = smov 96  }
  0x51   :  { %vm750_vm1 = vcmask 1043456   ;;  %vm1813_vm2 = vmmov 0   ;;  %vm650_vm3 = vcmask 64512   ;;  %vm1329_vm4 = vcmask 523264  }
  0x52   :  { %180 = vmatpush1.bf16.msra.mxu0 %v1624_v10  ;;  %v107_v31 = vsub.s32 %v104_v29, %v106_v28  ;;  %v147_v38 = vrot.slane %v88_v34, %v1929_v33  ;;  %v151_v39 = vrot.slane %v88_v34, %v150_v35 }
  0x53   :  { %125 = vadd.xlane.f32.xlu0 %v124_v5 }
  0x54   :  { %v1931_v36 = vrot.slane %v1397_v30, %v107_v31  ;;  %v115_v37 = vrot.slane %v101_v32, %v107_v31 }
  0x56   :  { %v116_v40 = vcombine.high %v1931_v36, %v1931_v36  ;;  %v117_v41 = vcombine.high %v115_v37, %v115_v37  ;;  %v1943_v49 = vrot.slane %v115_v37, %v1929_v33  ;;  %v241_v26 = vrot.slane %v1931_v36, %v1929_v33 }
  0x58   :  { %v1946_v50 = vrot.slane %v116_v40, %v1929_v33  ;;  %v1952_v55 = vrot.slane %v117_v41, %v1929_v33 }
  0xdc   :  { %v123_v11 = vpop.xlane.xlu0 %122 }
  0xdd   :  { %v128_v12 = vmul.f32 0.03125, %v123_v11 }
  0xdf   :  { %v130_v13 = vadd.f32 0.02, %v128_v12 }
  0xe0   :  { %v126_v14 = vpop.xlane.xlu0 %125 }
  0xe1   :  { %1633 = vrsqrt.f32 %v130_v13  ;;  %v129_v15 = vmul.f32 0.03125, %v126_v14 }
  0xe3   :  { %v131_v16 = vadd.f32 0.02, %v129_v15 }
  0xe5   :  { %1635 = vrsqrt.f32 %v131_v16 }
  0xeb   :  { %v1634_v17 = vpop.eup %1633 }
  0xec   :  { %v134_v18 = vmul.f32 %v1634_v17, %v1913_v0  ;;  %v1812_v17 = vmov 0.0  }
  0xed   :  { %1479 = vmatprep.subr.bf16.mxu1 %v1812_v17  ;;  %1485 = vmatprep.subr.bf16.mxu0 %v1812_v17 }
  0xee   :  { %v136_v22 = vmul.f32 %v134_v18, %v85_v20  ;;  %1481 = vmatprep.mubr.msk.bf16.mxu1 %vm1813_vm2, %v1812_v17 }
  0xef   :  { %v1636_v19 = vpop.eup %1635 }
  0xf0   :  { %v135_v21 = vmul.f32 %v1636_v19, %v1918_v1 }
  0xf2   :  { %v137_v23 = vmul.f32 %v135_v21, %v85_v20 }
  0xf4   :  { %v138_v24 = vpack.c.bf16 %v137_v23, %v136_v22 }
  0xf6   :  { %1402 = vmatmul.mubr.msk.bf16.vlgmr.msra.gmra.mrb[0].mxu0 %vm120_vm0, %v138_v24 }
  0xf7   :  { %1487 = vmatprep.mubr.msk.bf16.mxu0 %vm1813_vm2, %v1812_v17 }
 0x1c9   :  { %v211_v42 = vpop.f32.mrb[0].mxu0 }
 0x1ca   :  { %v212_v44 = vadd.f32 %v211_v42, %v147_v38  ;;  %v213_v45 = vpop.f32.mrb[1].mxu0 }
 0x1cb   :  { %v214_v47 = vadd.f32 %v213_v45, %v151_v39  ;;  %v215_v48 = vpop.f32.mrb[2].mxu0 }
 0x1cc   :  { %v216_v51 = vadd.f32 %v215_v48, %v147_v38  ;;  %v217_v52 = vpop.f32.mrb[3].mxu0  ;;  %v224_v54 = vmul.f32 %v220_v43, %v212_v44 }
 0x1cd   :  { %v1954_v56 = vmul.f32 %v221_v46, %v214_v47  ;;  %v218_v58 = vadd.f32 %v217_v52, %v151_v39 }
 0x1ce   :  { %230 = vrot.lane.b32.xlu1 %v224_v54, %s1811_s19  ;;  %v226_v62 = vmul.f32 %v222_v57, %v216_v51 }
 0x1cf   :  { %v1959_v59 = vmul.f32 %v223_v53, %v218_v58  ;;  %v276_v60 = vmul.f32 %v1943_v49, %v1954_v56  ;;  %v278_v61 = vmul.f32 %v1946_v50, %v1954_v56  ;;  %v280_v63 = vmul.f32 %v1952_v55, %v1954_v56 }
 0x1d0   :  { %v274_v40 = vmul.f32 %v241_v26, %v1954_v56 }
 0x1d1   :  { %v284_v2 = vpack.c.bf16 %v276_v60, %v276_v60  ;;  %v277_v3 = vmul.f32 %v1943_v49, %v1959_v59  ;;  %v286_v4 = vpack.c.bf16 %v278_v61, %v278_v61  ;;  %v279_v5 = vmul.f32 %v1946_v50, %v1959_v59 }
 0x1d2   :  { %232 = vrot.lane.b32.xlu1 %v226_v62, %s1811_s19  ;;  %v288_v6 = vpack.c.bf16 %v280_v63, %v280_v63  ;;  %v281_v7 = vmul.f32 %v1952_v55, %v1959_v59  ;;  %v282_v43 = vpack.c.bf16 %v274_v40, %v274_v40  ;;  %v275_v44 = vmul.f32 %v241_v26, %v1959_v59 }
 0x1d3   :  { %v1974_v8 = vsel %vm750_vm1, %v284_v2, 0  ;;  %v285_v9 = vpack.c.bf16 %v277_v3, %v277_v3  ;;  %v1977_v10 = vsel %vm750_vm1, %v286_v4, 0  ;;  %v287_v11 = vpack.c.bf16 %v279_v5, %v279_v5 }
 0x1d4   :  { %v1980_v12 = vsel %vm750_vm1, %v288_v6, 0  ;;  %v289_v13 = vpack.c.bf16 %v281_v7, %v281_v7  ;;  %v752_v47 = vsel %vm750_vm1, %v282_v43, 0  ;;  %v283_v48 = vpack.c.bf16 %v275_v44, %v275_v44 }
 0x1d5   :  { %v1983_v14 = vsel %vm750_vm1, %v285_v9, 0  ;;  %v1986_v15 = vsel %vm750_vm1, %v287_v11, 0 }
 0x1d6   :  { %v1989_v16 = vsel %vm750_vm1, %v289_v13, 0 }
 0x240   :  { %v231_v18 = vpop.permute.xlu1 %230 }
 0x241   :  { %v236_v19 = vadd.f32 %v231_v18, %v224_v54 }
 0x243   :  { %v1434_v20 = vpack.c.bf16 %v236_v19, %v236_v19  ;;  %v258_v27 = vmul.f32 %v241_v26, %v236_v19  ;;  %v260_v33 = vmul.f32 %v1943_v49, %v236_v19  ;;  %v262_v37 = vmul.f32 %v1946_v50, %v236_v19 }
 0x244   :  { %v233_v21 = vpop.permute.xlu1 %232  ;;  %v264_v42 = vmul.f32 %v1952_v55, %v236_v19 }
 0x245   :  { %v237_v22 = vadd.f32 %v233_v21, %v226_v62  ;;  %295 = vrot.lane.b32.xlu0 %v1434_v20, %s1806_s2  ;;  %v266_v30 = vpack.c.bf16 %v258_v27, %v258_v27  ;;  %v268_v34 = vpack.c.bf16 %v260_v33, %v260_v33  ;;  %v270_v38 = vpack.c.bf16 %v262_v37, %v262_v37 }
 0x246   :  { %v272_v45 = vpack.c.bf16 %v264_v42, %v264_v42 }
 0x247   :  { %v1435_v23 = vpack.c.bf16 %v237_v22, %v237_v22  ;;  %v259_v31 = vmul.f32 %v241_v26, %v237_v22  ;;  %v261_v35 = vmul.f32 %v1943_v49, %v237_v22  ;;  %v263_v39 = vmul.f32 %v1946_v50, %v237_v22 }
 0x248   :  { %v265_v46 = vmul.f32 %v1952_v55, %v237_v22  ;;  %v798_v50 = vsel %vm750_vm1, %v283_v48, 0 }
 0x249   :  { %344 = vrot.lane.b32.xlu1 %v1435_v23, %s1806_s2  ;;  %v267_v32 = vpack.c.bf16 %v259_v31, %v259_v31  ;;  %v269_v36 = vpack.c.bf16 %v261_v35, %v261_v35  ;;  %v271_v41 = vpack.c.bf16 %v263_v39, %v263_v39 }
 0x24a   :  { %v273_v49 = vpack.c.bf16 %v265_v46, %v265_v46 }
 0x2b7   :  { %v296_v24 = vpop.permute.xlu0 %295 }
 0x2b8   :  { %v301_v25 = vsel %vm120_vm0, %v296_v24, 0 }
 0x2b9   :  { %1480 = vmatpush3.bf16.xpose.msra.mxu1 %v301_v25 }
 0x2ba   :  { %1491 = vmatprep.subr.bf16.mxu1 %v1812_v17 }
 0x2bb   :  { %v345_v28 = vpop.permute.xlu1 %344 }
 0x2bc   :  { %v350_v29 = vsel %vm120_vm0, %v345_v28, 0 }
 0x2bd   :  { %1486 = vmatpush3.bf16.xpose.msra.mxu0 %v350_v29 }
 0x2be   :  { %1497 = vmatprep.subr.bf16.mxu0 %v1812_v17 }
 0x2c0   :  { %1482 = vmatmul.mubr.msk.bf16.vlgmr.msra.gmra.mrb[0].mxu1 %vm120_vm0, %v266_v30 }
 0x2c1   :  { %1492 = vmatpush3.bf16.xpose.msra.mxu1 %v301_v25  ;;  %1493 = vmatprep.mubr.msk.bf16.mxu1 %vm1813_vm2, %v1812_v17 }
 0x2c2   :  { %1503 = vmatprep.subr.bf16.mxu1 %v1812_v17 }
 0x2c4   :  { %1488 = vmatmul.mubr.msk.bf16.vlgmr.msra.gmra.mrb[4].mxu0 %vm120_vm0, %v267_v32 }
 0x2c5   :  { %1498 = vmatpush3.bf16.xpose.msra.mxu0 %v350_v29  ;;  %1499 = vmatprep.mubr.msk.bf16.mxu0 %vm1813_vm2, %v1812_v17 }
 0x2c6   :  { %1509 = vmatprep.subr.bf16.mxu0 %v1812_v17 }
 0x2c8   :  { %1494 = vmatmul.mubr.msk.bf16.vlgmr.msra.gmra.mrb[4].mxu1 %vm120_vm0, %v268_v34 }
 0x2c9   :  { %1504 = vmatpush3.bf16.xpose.msra.mxu1 %v301_v25  ;;  %1505 = vmatprep.mubr.msk.bf16.mxu1 %vm1813_vm2, %v1812_v17 }
 0x2ca   :  { %1515 = vmatprep.subr.bf16.mxu1 %v1812_v17 }
 0x2cc   :  { %1500 = vmatmul.mubr.msk.bf16.vlgmr.msra.gmra.mrb[8].mxu0 %vm120_vm0, %v269_v36 }
 0x2cd   :  { %1510 = vmatpush3.bf16.xpose.msra.mxu0 %v350_v29  ;;  %1511 = vmatprep.mubr.msk.bf16.mxu0 %vm1813_vm2, %v1812_v17 }
 0x2ce   :  { %1521 = vmatprep.subr.bf16.mxu0 %v1812_v17 }
 0x2d0   :  { %1506 = vmatmul.mubr.msk.bf16.vlgmr.msra.gmra.mrb[8].mxu1 %vm120_vm0, %v270_v38 }
 0x2d1   :  { %1516 = vmatpush3.bf16.xpose.msra.mxu1 %v301_v25  ;;  %1517 = vmatprep.mubr.msk.bf16.mxu1 %vm1813_vm2, %v1812_v17 }
 0x2d2   :  { %1527 = vmatprep.subr.bf16.mxu1 %v1812_v17 }
 0x2d4   :  { %1512 = vmatmul.mubr.msk.bf16.vlgmr.msra.gmra.mrb[12].mxu0 %vm120_vm0, %v271_v41 }
 0x2d5   :  { %1522 = vmatpush3.bf16.xpose.msra.mxu0 %v350_v29  ;;  %1523 = vmatprep.mubr.msk.bf16.mxu0 %vm1813_vm2, %v1812_v17 }
 0x2d6   :  { %1533 = vmatprep.subr.bf16.mxu0 %v1812_v17 }
 0x2d8   :  { %1518 = vmatmul.mubr.msk.bf16.vlgmr.msra.gmra.mrb[12].mxu1 %vm120_vm0, %v272_v45 }
 0x2d9   :  { %1528 = vmatpush3.bf16.msra.mxu1 %v752_v47  ;;  %1529 = vmatprep.mubr.msk.bf16.mxu1 %vm1813_vm2, %v1812_v17 }
 0x2da   :  { %1539 = vmatprep.subr.bf16.mxu1 %v1812_v17 }
 0x2dc   :  { %1524 = vmatmul.mubr.msk.bf16.vlgmr.msra.gmra.mrb[16].mxu0 %vm120_vm0, %v273_v49 }
 0x2dd   :  { %1534 = vmatpush3.bf16.msra.mxu0 %v798_v50  ;;  %1535 = vmatprep.mubr.msk.bf16.mxu0 %vm1813_vm2, %v1812_v17 }
 0x2de   :  { %1545 = vmatprep.subr.bf16.mxu0 %v1812_v17 }
 0x393   :  { %v337_v51 = vpop.f32.mrb[0].mxu1 }
 0x394   :  { %v1483_v52 = vpop.f32.mrb[1].mxu1  ;;  %v651_v53 = vsel %vm650_vm3, %v337_v51, -inf }
 0x395   :  { %v340_v54 = vpop.f32.mrb[2].mxu1  ;;  %652 = vmax.xlane.f32.xlu1 %v651_v53 }
 0x396   :  { %v1484_v55 = vpop.f32.mrb[3].mxu1 }
 0x397   :  { %v386_v56 = vpop.f32.mrb[4].mxu0 }
 0x398   :  { %v1489_v57 = vpop.f32.mrb[5].mxu0  ;;  %v654_v58 = vsel %vm650_vm3, %v386_v56, -inf }
 0x399   :  { %655 = vmax.xlane.f32.xlu0 %v654_v58  ;;  %v389_v59 = vpop.f32.mrb[6].mxu0 }
 0x39a   :  { %v1490_v60 = vpop.f32.mrb[7].mxu0 }
 0x39b   :  { %v429_v61 = vpop.f32.mrb[4].mxu1 }
 0x39c   :  { %v1495_v62 = vpop.f32.mrb[5].mxu1  ;;  %v657_v63 = vsel %vm650_vm3, %v429_v61, -inf }
 0x39d   :  { %v432_v2 = vpop.f32.mrb[6].mxu1  ;;  %658 = vmax.xlane.f32.xlu1 %v657_v63 }
 0x39e   :  { %v1496_v3 = vpop.f32.mrb[7].mxu1 }
 0x39f   :  { %v472_v4 = vpop.f32.mrb[8].mxu0 }
 0x3a0   :  { %v1501_v5 = vpop.f32.mrb[9].mxu0  ;;  %v660_v6 = vsel %vm650_vm3, %v472_v4, -inf }
 0x3a1   :  { %661 = vmax.xlane.f32.xlu1 %v660_v6  ;;  %v475_v7 = vpop.f32.mrb[10].mxu0 }
 0x3a2   :  { %v1502_v9 = vpop.f32.mrb[11].mxu0 }
 0x3a3   :  { %v515_v11 = vpop.f32.mrb[8].mxu1 }
 0x3a4   :  { %v1507_v13 = vpop.f32.mrb[9].mxu1  ;;  %v663_v18 = vsel %vm650_vm3, %v515_v11, -inf }
 0x3a5   :  { %v518_v19 = vpop.f32.mrb[10].mxu1  ;;  %664 = vmax.xlane.f32.xlu1 %v663_v18 }
 0x3a6   :  { %v1508_v20 = vpop.f32.mrb[11].mxu1 }
 0x3a7   :  { %v558_v21 = vpop.f32.mrb[12].mxu0 }
 0x3a8   :  { %v1513_v22 = vpop.f32.mrb[13].mxu0  ;;  %v666_v23 = vsel %vm650_vm3, %v558_v21, -inf }
 0x3a9   :  { %667 = vmax.xlane.f32.xlu1 %v666_v23  ;;  %v561_v24 = vpop.f32.mrb[14].mxu0 }
 0x3aa   :  { %v1514_v25 = vpop.f32.mrb[15].mxu0 }
 0x3ab   :  { %v601_v26 = vpop.f32.mrb[12].mxu1 }
 0x3ac   :  { %v1519_v27 = vpop.f32.mrb[13].mxu1  ;;  %v669_v28 = vsel %vm650_vm3, %v601_v26, -inf }
 0x3ad   :  { %v604_v29 = vpop.f32.mrb[14].mxu1  ;;  %670 = vmax.xlane.f32.xlu0 %v669_v28 }
 0x3ae   :  { %v1520_v30 = vpop.f32.mrb[15].mxu1 }
 0x3af   :  { %v644_v31 = vpop.f32.mrb[16].mxu0 }
 0x3b0   :  { %v1525_v32 = vpop.f32.mrb[17].mxu0  ;;  %v672_v33 = vsel %vm650_vm3, %v644_v31, -inf }
 0x3b1   :  { %673 = vmax.xlane.f32.xlu1 %v672_v33  ;;  %v647_v34 = vpop.f32.mrb[18].mxu0 }
 0x3b2   :  { %v1526_v35 = vpop.f32.mrb[19].mxu0 }
 0x422   :  { %v653_v36 = vpop.xlane.xlu1 %652 }
 0x423   :  { %v675_v37 = vsub.f32 %v337_v51, %v653_v36 }
 0x425   :  { %v683_v38 = vmul.f32 1.442695, %v675_v37 }
 0x426   :  { %v656_v39 = vpop.xlane.xlu0 %655 }
 0x427   :  { %1637 = vpow2.f32 %v683_v38  ;;  %v676_v40 = vsub.f32 %v386_v56, %v656_v39 }
 0x429   :  { %v685_v41 = vmul.f32 1.442695, %v676_v40 }
 0x42a   :  { %v659_v42 = vpop.xlane.xlu1 %658 }
 0x42b   :  { %1639 = vpow2.f32 %v685_v41  ;;  %v677_v43 = vsub.f32 %v429_v61, %v659_v42 }
 0x42d   :  { %v687_v44 = vmul.f32 1.442695, %v677_v43 }
 0x42e   :  { %v662_v45 = vpop.xlane.xlu1 %661 }
 0x42f   :  { %1641 = vpow2.f32 %v687_v44  ;;  %v678_v46 = vsub.f32 %v472_v4, %v662_v45 }
 0x431   :  { %v1638_v47 = vpop.eup %1637  ;;  %v689_v48 = vmul.f32 1.442695, %v678_v46 }
 0x432   :  { %v665_v49 = vpop.xlane.xlu1 %664  ;;  %v699_v50 = vsel %vm650_vm3, %v1638_v47, 0.0 }
 0x433   :  { %1643 = vpow2.f32 %v689_v48  ;;  %v679_v52 = vsub.f32 %v515_v11, %v665_v49  ;;  %700 = vadd.xlane.f32.xlu0 %v699_v50  ;;  %v1626_v48 = vld [vmem:[#allocation7 + $0x8] sm:$0xff]  }
 0x435   :  { %v1640_v51 = vpop.eup %1639  ;;  %v691_v53 = vmul.f32 1.442695, %v679_v52 }
 0x436   :  { %v668_v54 = vpop.xlane.xlu1 %667  ;;  %v702_v55 = vsel %vm650_vm3, %v1640_v51, 0.0 }
 0x437   :  { %1645 = vpow2.f32 %v691_v53  ;;  %v680_v56 = vsub.f32 %v558_v21, %v668_v54  ;;  %703 = vadd.xlane.f32.xlu1 %v702_v55 }
 0x439   :  { %v1642_v57 = vpop.eup %1641  ;;  %v693_v58 = vmul.f32 1.442695, %v680_v56 }
 0x43a   :  { %v671_v59 = vpop.xlane.xlu0 %670  ;;  %v705_v60 = vsel %vm650_vm3, %v1642_v57, 0.0 }
 0x43b   :  { %1647 = vpow2.f32 %v693_v58  ;;  %v681_v61 = vsub.f32 %v601_v26, %v671_v59  ;;  %706 = vadd.xlane.f32.xlu0 %v705_v60 }
 0x43d   :  { %v1644_v62 = vpop.eup %1643  ;;  %v695_v63 = vmul.f32 1.442695, %v681_v61 }
 0x43e   :  { %v674_v2 = vpop.xlane.xlu1 %673  ;;  %v708_v3 = vsel %vm650_vm3, %v1644_v62, 0.0 }
 0x43f   :  { %1649 = vpow2.f32 %v695_v63  ;;  %v682_v4 = vsub.f32 %v644_v31, %v674_v2  ;;  %709 = vadd.xlane.f32.xlu1 %v708_v3 }
 0x441   :  { %v1646_v5 = vpop.eup %1645  ;;  %v697_v6 = vmul.f32 1.442695, %v682_v4 }
 0x442   :  { %v711_v7 = vsel %vm650_vm3, %v1646_v5, 0.0 }
 0x443   :  { %1651 = vpow2.f32 %v697_v6  ;;  %712 = vadd.xlane.f32.xlu0 %v711_v7 }
 0x445   :  { %v1648_v9 = vpop.eup %1647 }
 0x446   :  { %v714_v11 = vsel %vm650_vm3, %v1648_v9, 0.0 }
 0x447   :  { %715 = vadd.xlane.f32.xlu1 %v714_v11 }
 0x449   :  { %v1650_v13 = vpop.eup %1649 }
 0x44a   :  { %v717_v18 = vsel %vm650_vm3, %v1650_v13, 0.0 }
 0x44b   :  { %718 = vadd.xlane.f32.xlu0 %v717_v18 }
 0x44d   :  { %v2062_v19 = vpop.eup %1651 }
 0x44e   :  { %v720_v20 = vsel %vm650_vm3, %v2062_v19, 0.0 }
 0x44f   :  { %721 = vadd.xlane.f32.xlu1 %v720_v20 }
 0x4c0   :  { %v701_v21 = vpop.xlane.xlu0 %700 }
 0x4c1   :  { %1653 = vrcp.f32 %v701_v21 }
 0x4c4   :  { %v704_v22 = vpop.xlane.xlu1 %703 }
 0x4c5   :  { %1655 = vrcp.f32 %v704_v22 }
 0x4c8   :  { %v707_v23 = vpop.xlane.xlu0 %706 }
 0x4c9   :  { %1657 = vrcp.f32 %v707_v23 }
 0x4cb   :  { %v1654_v24 = vpop.eup %1653 }
 0x4cc   :  { %v724_v25 = vmul.f32 %v1654_v24, %v1638_v47  ;;  %v710_v26 = vpop.xlane.xlu1 %709 }
 0x4cd   :  { %1659 = vrcp.f32 %v710_v26 }
 0x4ce   :  { %v739_v27 = vpack.c.bf16 %v724_v25, %v724_v25 }
 0x4cf   :  { %v1656_v28 = vpop.eup %1655 }
 0x4d0   :  { %v726_v29 = vmul.f32 %v1656_v28, %v1640_v51  ;;  %1530 = vmatmul.mubr.msk.bf16.vlgmr.msra.gmra.mrb[16].mxu1 %vm650_vm3, %v739_v27  ;;  %v713_v30 = vpop.xlane.xlu0 %712 }
 0x4d1   :  { %1540 = vmatpush3.bf16.msra.mxu1 %v1974_v8  ;;  %1661 = vrcp.f32 %v713_v30  ;;  %1541 = vmatprep.mubr.msk.bf16.mxu1 %vm1813_vm2, %v1812_v17 }
 0x4d2   :  { %v740_v31 = vpack.c.bf16 %v726_v29, %v726_v29  ;;  %1551 = vmatprep.subr.bf16.mxu1 %v1812_v17 }
 0x4d3   :  { %v1658_v32 = vpop.eup %1657 }
 0x4d4   :  { %v728_v33 = vmul.f32 %v1658_v32, %v1642_v57  ;;  %1536 = vmatmul.mubr.msk.bf16.vlgmr.msra.gmra.mrb[20].mxu0 %vm650_vm3, %v740_v31  ;;  %v716_v34 = vpop.xlane.xlu1 %715 }
 0x4d5   :  { %1546 = vmatpush3.bf16.msra.mxu0 %v1983_v14  ;;  %1663 = vrcp.f32 %v716_v34  ;;  %1547 = vmatprep.mubr.msk.bf16.mxu0 %vm1813_vm2, %v1812_v17 }
 0x4d6   :  { %v741_v35 = vpack.c.bf16 %v728_v33, %v728_v33  ;;  %1557 = vmatprep.subr.bf16.mxu0 %v1812_v17 }
 0x4d7   :  { %v1660_v8 = vpop.eup %1659 }
 0x4d8   :  { %v730_v36 = vmul.f32 %v1660_v8, %v1644_v62  ;;  %1542 = vmatmul.mubr.msk.bf16.vlgmr.msra.gmra.mrb[20].mxu1 %vm650_vm3, %v741_v35  ;;  %v719_v37 = vpop.xlane.xlu0 %718 }
 0x4d9   :  { %1552 = vmatpush3.bf16.msra.mxu1 %v1977_v10  ;;  %1665 = vrcp.f32 %v719_v37  ;;  %1553 = vmatprep.mubr.msk.bf16.mxu1 %vm1813_vm2, %v1812_v17 }
 0x4da   :  { %v742_v38 = vpack.c.bf16 %v730_v36, %v730_v36  ;;  %1563 = vmatprep.subr.bf16.mxu1 %v1812_v17 }
 0x4db   :  { %v1662_v14 = vpop.eup %1661 }
 0x4dc   :  { %v732_v39 = vmul.f32 %v1662_v14, %v1646_v5  ;;  %1548 = vmatmul.mubr.msk.bf16.vlgmr.msra.gmra.mrb[24].mxu0 %vm650_vm3, %v742_v38  ;;  %v722_v40 = vpop.xlane.xlu1 %721 }
 0x4dd   :  { %1558 = vmatpush3.bf16.msra.mxu0 %v1986_v15  ;;  %1667 = vrcp.f32 %v722_v40  ;;  %1559 = vmatprep.mubr.msk.bf16.mxu0 %vm1813_vm2, %v1812_v17 }
 0x4de   :  { %v743_v41 = vpack.c.bf16 %v732_v39, %v732_v39  ;;  %1569 = vmatprep.subr.bf16.mxu0 %v1812_v17  ;;  %v89_v39 = vld [vmem:[#allocation2 + $0x3] ss:$0 sm:$0xff] }
 0x4df   :  { %v1664_v10 = vpop.eup %1663 }
 0x4e0   :  { %v734_v42 = vmul.f32 %v1664_v10, %v1648_v9  ;;  %1554 = vmatmul.mubr.msk.bf16.vlgmr.msra.gmra.mrb[24].mxu1 %vm650_vm3, %v743_v41 }
 0x4e1   :  { %1564 = vmatpush3.bf16.msra.mxu1 %v1980_v12  ;;  %1565 = vmatprep.mubr.msk.bf16.mxu1 %vm1813_vm2, %v1812_v17 }
 0x4e2   :  { %v744_v43 = vpack.c.bf16 %v734_v42, %v734_v42  ;;  %1575 = vmatprep.subr.bf16.mxu1 %v1812_v17 }
 0x4e3   :  { %v1666_v15 = vpop.eup %1665 }
 0x4e4   :  { %v736_v44 = vmul.f32 %v1666_v15, %v1650_v13  ;;  %1560 = vmatmul.mubr.msk.bf16.vlgmr.msra.gmra.mrb[28].mxu0 %vm650_vm3, %v744_v43 }
 0x4e5   :  { %1570 = vmatpush3.bf16.msra.mxu0 %v1989_v16  ;;  %1571 = vmatprep.mubr.msk.bf16.mxu0 %vm1813_vm2, %v1812_v17  ;;  %v1625_v16 = vld [vmem:[#allocation7] sm:$0xff]  }
 0x4e6   :  { %v745_v45 = vpack.c.bf16 %v736_v44, %v736_v44  ;;  %1583 = vmatprep.subr.bf16.mxu0 %v1812_v17 }
 0x4e7   :  { %v1668_v46 = vpop.eup %1667 }
 0x4e8   :  { %v738_v12 = vmul.f32 %v1668_v46, %v2062_v19  ;;  %1566 = vmatmul.mubr.msk.bf16.vlgmr.msra.gmra.mrb[28].mxu1 %vm650_vm3, %v745_v45 }
 0x4e9   :  { %1579 = vmatprep.mubr.msk.bf16.mxu1 %vm1813_vm2, %v1812_v17  ;;  %1576 = vmatpush3.bf16.msra.mxu1 %v1625_v16 }
 0x4ea   :  { %v746_v47 = vpack.c.bf16 %v738_v12, %v738_v12  ;;  %1577 = vmatprep.subr.bf16.mxu1 %v1812_v17 }
 0x4ec   :  { %1572 = vmatmul.mubr.msk.bf16.vlgmr.msra.gmra.mrb[32].mxu0 %vm650_vm3, %v746_v47 }
 0x4ed   :  { %1587 = vmatprep.mubr.msk.bf16.mxu0 %vm1813_vm2, %v1812_v17  ;;  %1578 = vmatpush3.bf16.msra.mxu1 %v1626_v48  ;;  %v1627_v48 = vld [vmem:[#allocation8] sm:$0xff]  }
 0x4ee   :  { %1591 = vmatprep.subr.bf16.mxu1 %v1812_v17  ;;  %1584 = vmatpush3.bf16.msra.mxu0 %v1627_v48 }
 0x4ef   :  { %1585 = vmatprep.subr.bf16.mxu0 %v1812_v17 }
 0x5a3   :  { %v788_v49 = vpop.f32.mrb[16].mxu1 }
 0x5a4   :  { %v1531_v50 = vpop.f32.mrb[17].mxu1  ;;  %v1116_v58 = vsel %vm120_vm0, %v788_v49, 0.0 }
 0x5a5   :  { %v791_v52 = vpop.f32.mrb[18].mxu1 }
 0x5a6   :  { %v1532_v51 = vpop.f32.mrb[19].mxu1 }
 0x5a7   :  { %v834_v53 = vpop.f32.mrb[20].mxu0 }
 0x5a8   :  { %v1537_v54 = vpop.f32.mrb[21].mxu0  ;;  %v1123_v3 = vsel %vm120_vm0, %v834_v53, 0.0 }
 0x5a9   :  { %v837_v55 = vpop.f32.mrb[22].mxu0 }
 0x5aa   :  { %v1538_v56 = vpop.f32.mrb[23].mxu0 }
 0x5ab   :  { %v880_v57 = vpop.f32.mrb[20].mxu1 }
 0x5ac   :  { %v1117_v59 = vsel %vm120_vm0, %v880_v57, 0.0  ;;  %v1543_v60 = vpop.f32.mrb[21].mxu1  ;;  %v86_v57 = vld [vmem:[#allocation2 + $0x1] ss:$0 sm:$0xff] }
 0x5ad   :  { %v1118_v61 = vadd.f32 %v1117_v59, %v1116_v58  ;;  %v883_v62 = vpop.f32.mrb[22].mxu1 }
 0x5ae   :  { %v1544_v63 = vpop.f32.mrb[23].mxu1  ;;  %v1629_v62 = vld [vmem:[%s2174_s6] sm:$0xff]  }
 0x5af   :  { %v926_v2 = vpop.f32.mrb[24].mxu0  ;;  %v1630_v63 = vld [vmem:[%s2174_s6 + $0x8] sm:$0xff]  }
 0x5b0   :  { %v1124_v4 = vsel %vm120_vm0, %v926_v2, 0.0  ;;  %v1549_v5 = vpop.f32.mrb[25].mxu0  ;;  %v1631_v2 = vld [vmem:[%s2174_s6 + $0x10] sm:$0xff]  }
 0x5b1   :  { %v1125_v6 = vadd.f32 %v1124_v4, %v1123_v3  ;;  %v929_v7 = vpop.f32.mrb[26].mxu0  ;;  %v1632_v3 = vld [vmem:[%s2174_s6 + $0x18] sm:$0xff]   ;;  %v90_v4 = vld [vmem:[#allocation2 + $0x4] ss:$0 sm:$0xff]  ;;  %s1814_s6 = smov [#allocation10]  }
 0x5b2   :  { %v1550_v9 = vpop.f32.mrb[27].mxu0 }
 0x5b3   :  { %v972_v11 = vpop.f32.mrb[24].mxu1 }
 0x5b4   :  { %v1119_v13 = vsel %vm120_vm0, %v972_v11, 0.0  ;;  %v1555_v18 = vpop.f32.mrb[25].mxu1 }
 0x5b5   :  { %v1120_v19 = vadd.f32 %v1119_v13, %v1118_v61  ;;  %v975_v20 = vpop.f32.mrb[26].mxu1 }
 0x5b6   :  { %v1556_v21 = vpop.f32.mrb[27].mxu1 }
 0x5b7   :  { %v1018_v22 = vpop.f32.mrb[28].mxu0 }
 0x5b8   :  { %v1126_v23 = vsel %vm120_vm0, %v1018_v22, 0.0  ;;  %v1561_v24 = vpop.f32.mrb[29].mxu0 }
 0x5b9   :  { %v1127_v25 = vadd.f32 %v1126_v23, %v1125_v6  ;;  %v1021_v26 = vpop.f32.mrb[30].mxu0 }
 0x5ba   :  { %v1562_v27 = vpop.f32.mrb[31].mxu0 }
 0x5bb   :  { %v1064_v28 = vpop.f32.mrb[28].mxu1 }
 0x5bc   :  { %v1121_v29 = vsel %vm120_vm0, %v1064_v28, 0.0  ;;  %v1567_v30 = vpop.f32.mrb[29].mxu1 }
 0x5bd   :  { %v1122_v31 = vadd.f32 %v1121_v29, %v1120_v19  ;;  %v1067_v32 = vpop.f32.mrb[30].mxu1 }
 0x5be   :  { %v1568_v33 = vpop.f32.mrb[31].mxu1  ;;  %v91_v32 = vld [vmem:[#allocation2 + $0x5] ss:$0 sm:$0xff] }
 0x5bf   :  { %v1110_v34 = vpop.f32.mrb[32].mxu0 }
 0x5c0   :  { %v1128_v35 = vsel %vm120_vm0, %v1110_v34, 0.0  ;;  %v1573_v8 = vpop.f32.mrb[33].mxu0 }
 0x5c1   :  { %v1129_v36 = vadd.f32 %v1128_v35, %v1127_v25  ;;  %v1113_v37 = vpop.f32.mrb[34].mxu0 }
 0x5c2   :  { %v1574_v38 = vpop.f32.mrb[35].mxu0 }
 0x5c3   :  { %v1130_v14 = vpack.c.bf16 %v1129_v36, %v1122_v31 }
 0x5c5   :  { %1580 = vmatmul.mubr.msk.bf16.vlgmr.msra.gmra.mrb[32].mxu1 %vm120_vm0, %v1130_v14 }
 0x5c6   :  { %1599 = vmatprep.mubr.msk.bf16.mxu1 %vm1813_vm2, %v1812_v17  ;;  %1592 = vmatpush3.bf16.msra.mxu1 %v1629_v62 }
 0x5c7   :  { %1593 = vmatprep.subr.bf16.mxu1 %v1812_v17 }
 0x5ca   :  { %1594 = vmatpush3.bf16.msra.mxu1 %v1630_v63 }
 0x5cb   :  { %1595 = vmatprep.subr.bf16.mxu1 %v1812_v17 }
 0x5ce   :  { %1596 = vmatpush3.bf16.msra.mxu1 %v1631_v2 }
 0x5cf   :  { %1597 = vmatprep.subr.bf16.mxu1 %v1812_v17 }
 0x5d2   :  { %1598 = vmatpush3.bf16.msra.mxu1 %v1632_v3 }
 0x698   :  { %v1184_v40 = vpop.f32.mrb[32].mxu1 }
 0x699   :  { %v1185_v41 = vadd.f32 %v1184_v40, %v89_v39  ;;  %v1581_v10 = vpop.f32.mrb[33].mxu1 }
 0x69a   :  { %v1187_v42 = vpop.f32.mrb[34].mxu1 }
 0x69b   :  { %v2117_v43 = vadd.f32 %v1185_v41, %v1913_v0  ;;  %v1188_v15 = vadd.f32 %v1187_v42, %v89_v39  ;;  %v1582_v44 = vpop.f32.mrb[35].mxu1  ;;  %v1628_v0 = vld [vmem:[#allocation8 + $0x8] sm:$0xff]  }
 0x69c   :  { %1586 = vmatpush3.bf16.msra.mxu0 %v1628_v0 }
 0x69d   :  { %v2120_v45 = vadd.f32 %v1188_v15, %v1918_v1  ;;  %v1193_v46 = vmul.f32 %v2117_v43, %v2117_v43 }
 0x69f   :  { %v1195_v12 = vsel %vm120_vm0, %v1193_v46, 0.0  ;;  %v1194_v47 = vmul.f32 %v2120_v45, %v2120_v45 }
 0x6a0   :  { %1196 = vadd.xlane.f32.xlu0 %v1195_v12 }
 0x6a1   :  { %v1198_v16 = vsel %vm120_vm0, %v1194_v47, 0.0 }
 0x6a2   :  { %1199 = vadd.xlane.f32.xlu1 %v1198_v16 }
 0x72d   :  { %v1197_v1 = vpop.xlane.xlu0 %1196 }
 0x72e   :  { %v1201_v49 = vmul.f32 0.03125, %v1197_v1 }
 0x72f   :  { %v1200_v50 = vpop.xlane.xlu1 %1199 }
 0x730   :  { %v1203_v52 = vadd.f32 0.02, %v1201_v49  ;;  %v1202_v51 = vmul.f32 0.03125, %v1200_v50 }
 0x732   :  { %1669 = vrsqrt.f32 %v1203_v52  ;;  %v1204_v53 = vadd.f32 0.02, %v1202_v51 }
 0x734   :  { %1671 = vrsqrt.f32 %v1204_v53 }
 0x73c   :  { %v1670_v54 = vpop.eup %1669 }
 0x73d   :  { %v1207_v55 = vmul.f32 %v1670_v54, %v2117_v43 }
 0x73e   :  { %v1672_v56 = vpop.eup %1671 }
 0x73f   :  { %v1208_v58 = vmul.f32 %v1672_v56, %v2120_v45  ;;  %v1209_v59 = vmul.f32 %v1207_v55, %v86_v57 }
 0x741   :  { %v1210_v60 = vmul.f32 %v1208_v58, %v86_v57 }
 0x743   :  { %v1211_v61 = vpack.c.bf16 %v1210_v60, %v1209_v59 }
 0x745   :  { %1588 = vmatmul.mubr.msk.bf16.vlgmr.msra.gmra.mrb[36].mxu0 %vm120_vm0, %v1211_v61 }
 0x818   :  { %v1265_v5 = vpop.f32.mrb[36].mxu0 }
 0x819   :  { %v1266_v6 = vadd.f32 %v1265_v5, %v90_v4  ;;  %v1589_v7 = vpop.f32.mrb[37].mxu0 }
 0x81a   :  { %v1268_v9 = vpop.f32.mrb[38].mxu0 }
 0x81b   :  { %v1269_v11 = vadd.f32 %v1268_v9, %v90_v4  ;;  %1288 = vrot.lane.b32.xlu0 %v1266_v6, %s1806_s2  ;;  %v1590_v13 = vpop.f32.mrb[39].mxu0  ;;  %v1427_v18 = vmul.f32 -1.442695, %v1266_v6 }
 0x81d   :  { %1290 = vrot.lane.b32.xlu1 %v1269_v11, %s1806_s2  ;;  %v1428_v19 = vmul.f32 -1.442695, %v1269_v11  ;;  %1673 = vpow2.f32 %v1427_v18  ;;  %s1383_s2 = sshll.u32 %s1814_s6, 4  ;;  %s1384_s2 = int_to_ptr.vmem [resolvable:$true] %s1383_s2 }
 0x81e   :  { %s1769_s26 = scalar_lea.vmem %s1384_s2, 256  ;;  %p1774_p5 = scmp.lt.s32.totalorder %s1384_s2, %s1384_s2 }
 0x81f   :  { %1675 = vpow2.f32 %v1428_v19  ;;  %p1770_p4 = scmp.ne.s32.totalorder %s1384_s2, %s1769_s26  ;;  %p1775_p6 = scmp.lt.s32.totalorder %s1769_s26, %s1769_s26 }
 0x821   :  { %p1776_p7 = por %p1775_p6, %p1774_p5 }
 0x823   :  { %p1777_p8 = pnand %p1776_p7, %p1770_p4 }
 0x827   :  { %v1674_v17 = vpop.eup %1673 }
 0x828   :  { %v1278_v21 = vadd.f32 1.0, %v1674_v17 }
 0x829   :  { %v1676_v20 = vpop.eup %1675 }
 0x82a   :  { %v1279_v22 = vadd.f32 1.0, %v1676_v20  ;;  %1677 = vrcp.f32 %v1278_v21 }
 0x82c   :  { %1679 = vrcp.f32 %v1279_v22 }
 0x834   :  { %v1678_v23 = vpop.eup %1677 }
 0x835   :  { %v1284_v26 = vmul.f32 %v1678_v23, %v1266_v6 }
 0x836   :  { %v1680_v24 = vpop.eup %1679 }
 0x837   :  { %v1285_v27 = vmul.f32 %v1680_v24, %v1269_v11 }
 0x88d   :  { %v1289_v25 = vpop.permute.xlu0 %1288 }
 0x88e   :  { %v1294_v29 = vmul.f32 %v1289_v25, %v1284_v26 }
 0x88f   :  { %v1291_v28 = vpop.permute.xlu1 %1290 }
 0x890   :  { %v1295_v30 = vmul.f32 %v1291_v28, %v1285_v27 }
 0x892   :  { %v1296_v31 = vpack.c.bf16 %v1295_v30, %v1294_v29 }
 0x894   :  { %1600 = vmatmul.mubr.msk.bf16.vlgmr.msra.gmra.mrb[36].mxu1 %vm1329_vm4, %v1296_v31 }
 0x967   :  { %v1367_v33 = vpop.f32.mrb[36].mxu1 }
 0x968   :  { %v1368_v34 = vadd.f32 %v1367_v33, %v91_v32  ;;  %v1601_v35 = vpop.f32.mrb[37].mxu1 }
 0x969   :  { %v1370_v8 = vpop.f32.mrb[38].mxu1 }
 0x96a   :  { %v1374_v36 = vadd.f32 %v1368_v34, %v2117_v43  ;;  %v1371_v37 = vadd.f32 %v1370_v8, %v91_v32  ;;  %v1602_v38 = vpop.f32.mrb[39].mxu1 }
 0x96c   :  { %1376 = vst.msk [vmem:[#allocation10] sm:$0xff] %vm120_vm0, %v1374_v36  ;;  %v1375_v14 = vadd.f32 %v1371_v37, %v2120_v45 }
 0x96e   :  { %1377 = vst.msk [vmem:[#allocation10 + $0x8] sm:$0xff] %vm120_vm0, %v1375_v14 }
 0x96f   :  { %1780 = shalt.err (!%p1777_p8)
}
 0x970   :  { %s1781_s4 = scalar_lea.hbm %s2175_s7, 256 }
 0x971   :  { %p1782_p9 = scmp.ne.s32.totalorder %s2175_s7, %s1781_s4  ;;  %p1785_p10 = scmp.lt.u32.totalorder %s1781_s4, %s2175_s7 }
 0x973   :  { %p1787_p11 = pnand %p1785_p10, %p1782_p9 }
 0x975   :  { %1790 = shalt.err (!%p1787_p11)
}
 0x976   :  { %1389 = dma.vmem_to_hbm [thread:$0]  %s1384_s2, 256, %s2175_s7, [#allocation4], %s1800_s11, %s1800_s11, %s1801_s12  }
 0x977   :  { %1797 = dma.done.wait [#allocation4], 256  }
 0x978   :  { %1798 = vsyncadd [#allocation4], 4294967040 }
 0x979   :  { %1393 = vsyncpa [#allocation3], 1 }
 0x97a   :  { %1394 = vsyncpa [#allocation6], 1 }
 0x97b   :  { %1395 = vsyncpa [#allocation9], 1 }
 0x97c   :  { %1396 = vsyncpa [#allocation4], 1 }

</bundles_post_ra>
